<compile_context>
chip_gen: v6e
topology: v6e:2x2x1
jax: 0.10.0
libtpu: 0.0.40
codegen_flags: <defaults>
</compile_context>

<pallas_src>
import jax
import jax.numpy as jnp
from jax.experimental import pallas as pl
from jax.experimental.pallas import tpu as pltpu

_BRANCH_CFG = ((5, 2), (3, 1), (1, 0))   # (kernel_size, pad) for conv_1 / conv_2 / conv_3
_O_PER_BRANCH = 24


def _fused_conv_bn_relu_kernel(x_ref, w_ref, b_ref, o1_ref, o2_ref, o3_ref):
    """One (batch, L-tile) step for all three branches.

    x_ref:  (1, 1, C, T+4) bf16  tile of x with a 2-column halo on each side
    w_ref:  (5, 72, C)     bf16  BN-folded, tap-padded, branch-stacked weights (resident)
    b_ref:  (72, 1)        f32   folded bias (resident)
    o*_ref: (1, 24, T)     f32   per-branch output tile (channels on sublanes, L on lanes)
    """
    k_taps = w_ref.shape[0]
    tile_l = o1_ref.shape[-1]
    xw = x_ref[0, 0]                                           # (C, T+4) bf16

    # K=5 tap loop, statically unrolled: small bf16 MXU dots accumulated in f32.
    # xw[:, k:k+T] are static unaligned lane slices -> XLU shifts (free slot here).
    acc = jnp.dot(w_ref[0], xw[:, 0:tile_l],
                  preferred_element_type=jnp.float32)
    for k in range(1, k_taps):
        acc = acc + jnp.dot(w_ref[k], xw[:, k:k + tile_l],
                            preferred_element_type=jnp.float32)

    y = jnp.maximum(acc + b_ref[...], 0.0)                     # bias + ReLU epilogue (f32)

    o1_ref[0] = y[0 * _O_PER_BRANCH:1 * _O_PER_BRANCH].astype(o1_ref.dtype)
    o2_ref[0] = y[1 * _O_PER_BRANCH:2 * _O_PER_BRANCH].astype(o2_ref.dtype)
    o3_ref[0] = y[2 * _O_PER_BRANCH:3 * _O_PER_BRANCH].astype(o3_ref.dtype)


def _fold_branch(p, k, k_max, eps):
    """Fold eval-mode BN into conv weight/bias and center-pad kernel taps to k_max."""
    scale = p["gamma"] / jnp.sqrt(p["running_var"] + eps)            # (O,)
    w = p["w"] * scale[:, None, None]                                # (O, C, k)
    lpad = (k_max - k) // 2
    w = jnp.pad(w, ((0, 0), (0, 0), (lpad, k_max - k - lpad)))       # (O, C, k_max)
    bias = (p["b"] - p["running_mean"]) * scale + p["beta"]          # (O,)
    return w, bias


def _pick_tile_l(length):
    """Largest lane-dense tile (multiple of 128, <=1024) dividing L; else whole L."""
    for t in (1024, 512, 256, 128):
        if length % t == 0:
            return t
    return length


def ms_conv_hm_forward(x, params, *, eps=1e-5):
    """x: (N, C, L) float32; params: list of 3 branch dicts.  Returns 3 x (N, 24, L)."""
    N, C, L = x.shape
    k_max, pad_max = _BRANCH_CFG[0]
    halo = k_max - 1                                  # 2 left + 2 right columns per tile

    # --- fold BN + stack branches (cheap one-time parameter prep) ---
    ws, bs = [], []
    for (k, _), p in zip(_BRANCH_CFG, params):
        w, b = _fold_branch(p, k, k_max, eps)
        ws.append(w)
        bs.append(b)
    w_all = jnp.concatenate(ws, axis=0)                               # (72, C, 5)
    b_all = jnp.concatenate(bs, axis=0)                               # (72,)
    O = w_all.shape[0]
    w_koc = jnp.transpose(w_all, (2, 0, 1)).astype(jnp.bfloat16)      # (5, 72, C)
    bias2d = b_all.reshape(O, 1).astype(jnp.float32)                  # (72, 1)

    # --- L tiling + tile-local halo staging (bf16 stream to the kernel) ---
    tile_l = _pick_tile_l(L)
    num_tiles = L // tile_l
    x_pad = jnp.pad(x, ((0, 0), (0, 0), (pad_max, pad_max)))          # (N, C, L+4)
    x_tiles = jnp.stack(
        [x_pad[:, :, j * tile_l: j * tile_l + tile_l + halo] for j in range(num_tiles)],
        axis=1,
    ).astype(jnp.bfloat16)                                            # (N, nt, C, T+4)

    out_sds = jax.ShapeDtypeStruct((N, _O_PER_BRANCH, L), x.dtype)
    out_spec = pl.BlockSpec((1, _O_PER_BRANCH, tile_l), lambda n, j: (n, 0, j))

    outs = pl.pallas_call(
        _fused_conv_bn_relu_kernel,
        grid=(N, num_tiles),
        out_shape=(out_sds, out_sds, out_sds),
        in_specs=[
            # one (C, T+4) halo'd tile per step
            pl.BlockSpec((1, 1, C, tile_l + halo), lambda n, j: (n, j, 0, 0)),
            # tiny weights / bias stay resident across the whole grid
            pl.BlockSpec((k_max, O, C), lambda n, j: (0, 0, 0)),
            pl.BlockSpec((O, 1), lambda n, j: (0, 0)),
        ],
        out_specs=(out_spec, out_spec, out_spec),
        compiler_params=pltpu.CompilerParams(
            dimension_semantics=("parallel", "parallel")),
    )(x_tiles, w_koc, bias2d)
    return outs


def init_branch_params(key, i_dim, o_dim, kernel_size):
    """Deterministic parameter init matching the PyTorch module's shapes."""
    kw, kb = jax.random.split(key)
    fan_in = i_dim * kernel_size
    bound = 1.0 / jnp.sqrt(fan_in)
    w = jax.random.uniform(kw, (o_dim, i_dim, kernel_size), jnp.float32, -bound, bound)
    b = jax.random.uniform(kb, (o_dim,), jnp.float32, -bound, bound)
    gamma = jnp.ones((o_dim,), jnp.float32)
    beta = jnp.zeros((o_dim,), jnp.float32)
    running_mean = jnp.zeros((o_dim,), jnp.float32)
    running_var = jnp.ones((o_dim,), jnp.float32)
    return dict(w=w, b=b, gamma=gamma, beta=beta,
                running_mean=running_mean, running_var=running_var)


def _reference_branch(x, p, pad, eps=1e-5):
    """Pure-JAX reference (Conv1d + eval-mode BN + ReLU) for correctness checking."""
    y = jax.lax.conv_general_dilated(
        x, p["w"], window_strides=(1,), padding=[(pad, pad)],
        dimension_numbers=("NCH", "OIH", "NCH"))
    y = y + p["b"][None, :, None]
    y = (y - p["running_mean"][None, :, None]) / jnp.sqrt(
        p["running_var"][None, :, None] + eps)
    y = y * p["gamma"][None, :, None] + p["beta"][None, :, None]
    return jnp.maximum(y, 0.0)


if __name__ == "__main__":
    key = jax.random.PRNGKey(0)
    k_x, k1, k2, k3 = jax.random.split(key, 4)

    N, i_dim, L = 2, 4, 16
    x = jax.random.normal(k_x, (N, i_dim, L), jnp.float32)

    params = [
        init_branch_params(k1, i_dim, 24, 5),
        init_branch_params(k2, i_dim, 24, 3),
        init_branch_params(k3, i_dim, 24, 1),
    ]

    outs = ms_conv_hm_forward(x, params)
    outs = jax.block_until_ready(outs)

    # Sanity check against pure-JAX f32 reference.  Tolerance loosened because the
    # kernel streams x / weights to the MXU in bf16 (f32 accumulation).
    refs = [_reference_branch(x, p, pad) for (_, pad), p in zip(_BRANCH_CFG, params)]
    for o, r in zip(outs, refs):
        assert o.shape == (N, 24, L), o.shape
        assert jnp.allclose(o, r, atol=2e-2, rtol=2e-2), (
            f"mismatch vs reference (max abs err {jnp.max(jnp.abs(o - r))})")

    print("KERNEL_OK")
</pallas_src>

<mosaic_0001>
module attributes {stable_mosaic.version = 11 : i64} {
  func.func @_fused_conv_bn_relu_kernel(%arg0: i32, %arg1: i32, %arg2: memref<1x1x4x20xbf16, #tpu.memory_space<vmem>>, %arg3: memref<5x72x4xbf16, #tpu.memory_space<vmem>>, %arg4: memref<72x1xf32, #tpu.memory_space<vmem>>, %arg5: memref<1x24x16xf32, #tpu.memory_space<vmem>>, %arg6: memref<1x24x16xf32, #tpu.memory_space<vmem>>, %arg7: memref<1x24x16xf32, #tpu.memory_space<vmem>>) attributes {dimension_semantics = [#tpu.dimension_semantics<parallel>, #tpu.dimension_semantics<parallel>], iteration_bounds = array<i64: 2, 1>, scalar_prefetch = 0 : i64, scratch_operands = 0 : i64, tpu.core_type = #tpu.core_type<tc>, window_params = [{transform_indices = @transform_0, window_bounds = array<i64: 1, 1, 4, 20>}, {pipeline_mode = #tpu.pipeline_mode<synchronous>, transform_indices = @transform_1, window_bounds = array<i64: 5, 72, 4>}, {pipeline_mode = #tpu.pipeline_mode<synchronous>, transform_indices = @transform_2, window_bounds = array<i64: 72, 1>}, {transform_indices = @transform_3, window_bounds = array<i64: 1, 24, 16>}, {transform_indices = @transform_4, window_bounds = array<i64: 1, 24, 16>}, {transform_indices = @transform_5, window_bounds = array<i64: 1, 24, 16>}]} {
    %c0 = arith.constant 0 : index
    %c0_0 = arith.constant 0 : index
    %c0_1 = arith.constant 0 : index
    %c0_2 = arith.constant 0 : index
    %0 = vector.load %arg2[%c0, %c0_0, %c0_1, %c0_2] : memref<1x1x4x20xbf16, #tpu.memory_space<vmem>>, vector<1x1x4x20xbf16>
    %1 = vector.shape_cast %0 : vector<1x1x4x20xbf16> to vector<4x20xbf16>
    %c0_3 = arith.constant 0 : index
    %c0_4 = arith.constant 0 : index
    %c0_5 = arith.constant 0 : index
    %2 = vector.load %arg3[%c0_3, %c0_4, %c0_5] : memref<5x72x4xbf16, #tpu.memory_space<vmem>>, vector<1x72x4xbf16>
    %3 = vector.shape_cast %2 : vector<1x72x4xbf16> to vector<72x4xbf16>
    %4 = vector.extract_strided_slice %1 {offsets = [0, 0], sizes = [4, 16], strides = [1, 1]} : vector<4x20xbf16> to vector<4x16xbf16>
    %cst = arith.constant dense<0.000000e+00> : vector<72x16xf32>
    %5 = tpu.matmul %3, %4, %cst {dimension_numbers = #tpu.dot_dimension_numbers<[1], [0], [0], [1], [0, 0, 1, 1], [], []>} : vector<72x4xbf16>, vector<4x16xbf16>, vector<72x16xf32> -> vector<72x16xf32>
    %c1 = arith.constant 1 : index
    %c0_6 = arith.constant 0 : index
    %c0_7 = arith.constant 0 : index
    %6 = vector.load %arg3[%c1, %c0_6, %c0_7] : memref<5x72x4xbf16, #tpu.memory_space<vmem>>, vector<1x72x4xbf16>
    %7 = vector.shape_cast %6 : vector<1x72x4xbf16> to vector<72x4xbf16>
    %8 = vector.extract_strided_slice %1 {offsets = [0, 1], sizes = [4, 16], strides = [1, 1]} : vector<4x20xbf16> to vector<4x16xbf16>
    %cst_8 = arith.constant dense<0.000000e+00> : vector<72x16xf32>
    %9 = tpu.matmul %7, %8, %cst_8 {dimension_numbers = #tpu.dot_dimension_numbers<[1], [0], [0], [1], [0, 0, 1, 1], [], []>} : vector<72x4xbf16>, vector<4x16xbf16>, vector<72x16xf32> -> vector<72x16xf32>
    %10 = arith.addf %5, %9 : vector<72x16xf32>
    %c2 = arith.constant 2 : index
    %c0_9 = arith.constant 0 : index
    %c0_10 = arith.constant 0 : index
    %11 = vector.load %arg3[%c2, %c0_9, %c0_10] : memref<5x72x4xbf16, #tpu.memory_space<vmem>>, vector<1x72x4xbf16>
    %12 = vector.shape_cast %11 : vector<1x72x4xbf16> to vector<72x4xbf16>
    %13 = vector.extract_strided_slice %1 {offsets = [0, 2], sizes = [4, 16], strides = [1, 1]} : vector<4x20xbf16> to vector<4x16xbf16>
    %cst_11 = arith.constant dense<0.000000e+00> : vector<72x16xf32>
    %14 = tpu.matmul %12, %13, %cst_11 {dimension_numbers = #tpu.dot_dimension_numbers<[1], [0], [0], [1], [0, 0, 1, 1], [], []>} : vector<72x4xbf16>, vector<4x16xbf16>, vector<72x16xf32> -> vector<72x16xf32>
    %15 = arith.addf %10, %14 : vector<72x16xf32>
    %c3 = arith.constant 3 : index
    %c0_12 = arith.constant 0 : index
    %c0_13 = arith.constant 0 : index
    %16 = vector.load %arg3[%c3, %c0_12, %c0_13] : memref<5x72x4xbf16, #tpu.memory_space<vmem>>, vector<1x72x4xbf16>
    %17 = vector.shape_cast %16 : vector<1x72x4xbf16> to vector<72x4xbf16>
    %18 = vector.extract_strided_slice %1 {offsets = [0, 3], sizes = [4, 16], strides = [1, 1]} : vector<4x20xbf16> to vector<4x16xbf16>
    %cst_14 = arith.constant dense<0.000000e+00> : vector<72x16xf32>
    %19 = tpu.matmul %17, %18, %cst_14 {dimension_numbers = #tpu.dot_dimension_numbers<[1], [0], [0], [1], [0, 0, 1, 1], [], []>} : vector<72x4xbf16>, vector<4x16xbf16>, vector<72x16xf32> -> vector<72x16xf32>
    %20 = arith.addf %15, %19 : vector<72x16xf32>
    %c4 = arith.constant 4 : index
    %c0_15 = arith.constant 0 : index
    %c0_16 = arith.constant 0 : index
    %21 = vector.load %arg3[%c4, %c0_15, %c0_16] : memref<5x72x4xbf16, #tpu.memory_space<vmem>>, vector<1x72x4xbf16>
    %22 = vector.shape_cast %21 : vector<1x72x4xbf16> to vector<72x4xbf16>
    %23 = vector.extract_strided_slice %1 {offsets = [0, 4], sizes = [4, 16], strides = [1, 1]} : vector<4x20xbf16> to vector<4x16xbf16>
    %cst_17 = arith.constant dense<0.000000e+00> : vector<72x16xf32>
    %24 = tpu.matmul %22, %23, %cst_17 {dimension_numbers = #tpu.dot_dimension_numbers<[1], [0], [0], [1], [0, 0, 1, 1], [], []>} : vector<72x4xbf16>, vector<4x16xbf16>, vector<72x16xf32> -> vector<72x16xf32>
    %25 = arith.addf %20, %24 : vector<72x16xf32>
    %c0_18 = arith.constant 0 : index
    %c0_19 = arith.constant 0 : index
    %26 = vector.load %arg4[%c0_18, %c0_19] : memref<72x1xf32, #tpu.memory_space<vmem>>, vector<72x1xf32>
    %27 = vector.broadcast %26 : vector<72x1xf32> to vector<72x16xf32>
    %28 = arith.addf %25, %27 : vector<72x16xf32>
    %cst_20 = arith.constant 0.000000e+00 : f32
    %29 = vector.broadcast %cst_20 : f32 to vector<72x16xf32>
    %30 = arith.maximumf %28, %29 : vector<72x16xf32>
    %31 = vector.extract_strided_slice %30 {offsets = [0, 0], sizes = [24, 16], strides = [1, 1]} : vector<72x16xf32> to vector<24x16xf32>
    %c0_21 = arith.constant 0 : index
    %c0_22 = arith.constant 0 : index
    %c0_23 = arith.constant 0 : index
    %32 = vector.load %arg5[%c0_21, %c0_22, %c0_23] : memref<1x24x16xf32, #tpu.memory_space<vmem>>, vector<1x24x16xf32>
    %33 = vector.shape_cast %32 : vector<1x24x16xf32> to vector<24x16xf32>
    %34 = vector.shape_cast %31 : vector<24x16xf32> to vector<1x24x16xf32>
    tpu.vector_store %arg5[%c0_21, %c0_22, %c0_23], %34 {strides = array<i32>} : memref<1x24x16xf32, #tpu.memory_space<vmem>>, vector<1x24x16xf32>,
    %35 = vector.extract_strided_slice %30 {offsets = [24, 0], sizes = [24, 16], strides = [1, 1]} : vector<72x16xf32> to vector<24x16xf32>
    %c0_24 = arith.constant 0 : index
    %c0_25 = arith.constant 0 : index
    %c0_26 = arith.constant 0 : index
    %36 = vector.load %arg6[%c0_24, %c0_25, %c0_26] : memref<1x24x16xf32, #tpu.memory_space<vmem>>, vector<1x24x16xf32>
    %37 = vector.shape_cast %36 : vector<1x24x16xf32> to vector<24x16xf32>
    %38 = vector.shape_cast %35 : vector<24x16xf32> to vector<1x24x16xf32>
    tpu.vector_store %arg6[%c0_24, %c0_25, %c0_26], %38 {strides = array<i32>} : memref<1x24x16xf32, #tpu.memory_space<vmem>>, vector<1x24x16xf32>,
    %39 = vector.extract_strided_slice %30 {offsets = [48, 0], sizes = [24, 16], strides = [1, 1]} : vector<72x16xf32> to vector<24x16xf32>
    %c0_27 = arith.constant 0 : index
    %c0_28 = arith.constant 0 : index
    %c0_29 = arith.constant 0 : index
    %40 = vector.load %arg7[%c0_27, %c0_28, %c0_29] : memref<1x24x16xf32, #tpu.memory_space<vmem>>, vector<1x24x16xf32>
    %41 = vector.shape_cast %40 : vector<1x24x16xf32> to vector<24x16xf32>
    %42 = vector.shape_cast %39 : vector<24x16xf32> to vector<1x24x16xf32>
    tpu.vector_store %arg7[%c0_27, %c0_28, %c0_29], %42 {strides = array<i32>} : memref<1x24x16xf32, #tpu.memory_space<vmem>>, vector<1x24x16xf32>,
    return
  }
  func.func @transform_0(%arg0: i32, %arg1: i32) -> (i32, i32, i32, i32) {
    %c0_i32 = arith.constant 0 : i32
    %c0_i32_0 = arith.constant 0 : i32
    %c0_i32_1 = arith.constant 0 : i32
    return %arg0, %arg1, %c0_i32, %c0_i32_0 : i32, i32, i32, i32
  }
  func.func @transform_1(%arg0: i32, %arg1: i32) -> (i32, i32, i32) {
    %c0_i32 = arith.constant 0 : i32
    %c0_i32_0 = arith.constant 0 : i32
    %c0_i32_1 = arith.constant 0 : i32
    %c0_i32_2 = arith.constant 0 : i32
    return %c0_i32, %c0_i32_0, %c0_i32_1 : i32, i32, i32
  }
  func.func @transform_2(%arg0: i32, %arg1: i32) -> (i32, i32) {
    %c0_i32 = arith.constant 0 : i32
    %c0_i32_0 = arith.constant 0 : i32
    %c0_i32_1 = arith.constant 0 : i32
    return %c0_i32, %c0_i32_0 : i32, i32
  }
  func.func @transform_3(%arg0: i32, %arg1: i32) -> (i32, i32, i32) {
    %c0_i32 = arith.constant 0 : i32
    %c0_i32_0 = arith.constant 0 : i32
    return %arg0, %c0_i32, %arg1 : i32, i32, i32
  }
  func.func @transform_4(%arg0: i32, %arg1: i32) -> (i32, i32, i32) {
    %c0_i32 = arith.constant 0 : i32
    %c0_i32_0 = arith.constant 0 : i32
    return %arg0, %c0_i32, %arg1 : i32, i32, i32
  }
  func.func @transform_5(%arg0: i32, %arg1: i32) -> (i32, i32, i32) {
    %c0_i32 = arith.constant 0 : i32
    %c0_i32_0 = arith.constant 0 : i32
    return %arg0, %c0_i32, %arg1 : i32, i32, i32
  }
}

</mosaic_0001>

<bundles_post_ra>
// kernel: tpu_custom_call.1
= control target key start
LH: loop header
LB: loop body
LE: loop exit
PB: predicated region body
PF: predicated region fallthrough
CT: control target
= control target key end

     0   :  { %s1572_s18 = smov 0   ;;  %s1574_s19 = smov 0   ;;  %s1878_s0 = inlined_call_operand.vmem [shape: bf16[2,1,4,20], index: 0, kind: input, shape index: {}]   ;;  %s1879_s1 = inlined_call_operand.vmem [shape: bf16[5,72,4], index: 1, kind: input, shape index: {}]   ;;  %s1880_s2 = inlined_call_operand.vmem [shape: f32[72,1], index: 2, kind: input, shape index: {}]   ;;  %s1881_s3 = inlined_call_operand.vmem [shape: f32[2,24,16], index: 3, kind: output, shape index: {0}]   ;;  %s1882_s4 = inlined_call_operand.vmem [shape: f32[2,24,16], index: 4, kind: output, shape index: {1}]   ;;  %s1883_s5 = inlined_call_operand.vmem [shape: f32[2,24,16], index: 5, kind: output, shape index: {2}]  }
   0x1   :  { %s1576_s20 = smov 0  }
   0x2 LB: > { %s28_s21 = sadd.s32 1, %s1528_s19  ;;  %p1215_p0 = scmp.ge.s32.totalorder %s1532_s20, 1  ;;  %s1532_s20 = sphi %s1576_s20, %s16_s20   ;;  %s1528_s19 = sphi %s1574_s19, %s1885_s19   ;;  %s1524_s18 = sphi %s1572_s18, %s1884_s18  }
   0x3   : > { %p30_p1 = scmp.ge.s32.totalorder %s28_s21, 2  ;;  %p214_p2 = scmp.lt.s32.totalorder %s1532_s20, 3 }
   0x5   : > { %s1887_s21 = smov (%p30_p1, %s28_s21), 0  ;;  %p215_p3 = pnand %p1215_p0, %p214_p2 }
   0x6   : > { %p263_p4 = scmp.lt.s32.totalorder (!%p215_p3), %s1524_s18, 1  ;;  %s1537_s26 = smov (!%p215_p3), 127  }
   0x7   : > { %218 = sbr.rel (%p215_p3) target bundleno = 436 (0x1b4), region = 32  ;;  %s1538_s27 = smov (!%p215_p3), 125  }
   0x8   : > { %s1539_s28 = smov (!%p215_p3), 126   ;;  %s1540_s29 = smov (!%p215_p3), 124  }
   0xc   : > { %v342_v0 = vlaneseq  ;;  %v1534_v1 = vmov 1983009808   ;;  %v1535_v3 = vmov 0.0   ;;  %s1889_s18 = smov (!%p263_p4, %s1524_s18), 1  ;;  %vm1536_vm0 = vmmov 0   ;;  %v955_v9 = vld [vmem:[%s1880_s2] sm:$0xff] }
   0xd   : > { %v340_v2 = vunpack.c.l.s4 %v1534_v1  ;;  %1338 = vmatprep.subr.bf16.mxu0 %v1535_v3  ;;  %1448 = vmatprep.subr.bf16.mxu1 %v1535_v3  ;;  %s1216_s22 = sshll.u32 %s1889_s18, 1  ;;  %v956_v10 = vld [vmem:[%s1880_s2 + $0x8] sm:$0xff]  ;;  %v1541_v11 = vmov 0   ;;  %v957_v12 = vld [vmem:[%s1880_s2 + $0x10] sm:$0xff]  ;;  %v958_v13 = vld [vmem:[%s1880_s2 + $0x18] sm:$0xff]  ;;  %vm364_vm1 = vcmask 1041408  }
   0xe   : > { %v343_v4 = vshrl.u32 %v342_v0, 7  ;;  %1340 = vmatprep.mubr.msk.bf16.mxu0 %vm1536_vm0, %v1535_v3  ;;  %1352 = vmatprep.mubr.msk.bf16.mxu1 %vm1536_vm0, %v1535_v3  ;;  %s269_s25 = scalar_lea.vmem %s1878_s0, %s1216_s22  ;;  %v959_v14 = vld [vmem:[%s1880_s2 + $0x20] sm:$0xff]  ;;  %v960_v15 = vld [vmem:[%s1880_s2 + $0x28] sm:$0xff]  ;;  %v961_v16 = vld [vmem:[%s1880_s2 + $0x30] sm:$0xff]  ;;  %vm348_vm2 = vcmask 31744   ;;  %s1819_s10 = smul.u32 24, %s1889_s18 }
   0xf   : > { %v341_v5 = vunpack.c.0.s8 %v340_v2  ;;  %v295_v7 = vld [vmem:[%s269_s25] sm:$0x3]  ;;  %1483 = vset.pattern.permute.xlu0 %v1541_v11  ;;  %1484 = vset.pattern.permute.xlu1 %v1541_v11  ;;  %v962_v17 = vld [vmem:[%s1880_s2 + $0x38] sm:$0xff]  ;;  %v1485_v21 = vld [vmem:[%s1879_s1 + $0x24] sm:$0xff]   ;;  %vm1027_vm3 = vcmask 130048  }
  0x10   : > { %v963_v18 = vld [vmem:[%s1880_s2 + $0x40] sm:$0xff]  ;;  %v479_v24 = vsel %vm364_vm1, %v295_v7, 0  ;;  %v1487_v26 = vld [vmem:[%s1879_s1 + $0x2c] sm:$0xff]   ;;  %v1489_v29 = vld [vmem:[%s1879_s1 + $0x34] sm:$0xff]   ;;  %s1826_s13 = scalar_lea.vmem %s1881_s3, %s1819_s10  ;;  %s1844_s15 = scalar_lea.vmem %s1882_s4, %s1819_s10 }
  0x11   : > { %v344_v6 = vsub.s32 %v341_v5, %v343_v4  ;;  %v1486_v22 = vld [vmem:[%s1879_s1 + $0x3c] sm:$0xff]   ;;  %v1488_v27 = vld [vmem:[%s1879_s1 + $0x44] ss:$0 sps:$4 sm:$0xff]   ;;  %v1491_v33 = vld [vmem:[%s1879_s1 + $0x8] sm:$0xff]   ;;  %s293_s22 = scalar_lea.vmem %s1883_s5, %s1819_s10 }
  0x12   : > { %v1490_v30 = vld [vmem:[%s1879_s1] sm:$0xff]   ;;  %v1492_v34 = vld [vmem:[%s1879_s1 + $0x48] sm:$0xff]   ;;  %v1493_v36 = vld [vmem:[%s1879_s1 + $0x10] sm:$0xff]  }
  0x13   : > { %v345_v8 = vrot.slane %v295_v7, %v344_v6  ;;  %v1494_v37 = vld [vmem:[%s1879_s1 + $0x50] sm:$0xff]   ;;  %v1495_v38 = vld [vmem:[%s1879_s1 + $0x18] sm:$0xff]   ;;  %v1497_v40 = vld [vmem:[%s1879_s1 + $0x20] ss:$0 sps:$4 sm:$0xff]  }
  0x14   : > { %v1496_v39 = vld [vmem:[%s1879_s1 + $0x58] sm:$0xff]   ;;  %v1498_v41 = vld [vmem:[%s1879_s1 + $0x60] sm:$0xff]   ;;  %v1499_v42 = vld [vmem:[%s1879_s1 + $0x68] ss:$0 sps:$4 sm:$0xff]  }
  0x15   : > { %346 = vrot.lane.b32.xlu0 %v345_v8, %s1537_s26  ;;  %720 = vrot.lane.b32.xlu1 %v345_v8, %s1538_s27  ;;  %v1500_v43 = vld [vmem:[%s1879_s1 + $0x6c] sm:$0xff]   ;;  %v1501_v44 = vld [vmem:[%s1879_s1 + $0x74] sm:$0xff]  }
  0x16   : > { %v1502_v45 = vld [vmem:[%s1879_s1 + $0x90] sm:$0xff]   ;;  %v1503_v46 = vld [vmem:[%s1879_s1 + $0x7c] sm:$0xff]   ;;  %v1505_v48 = vld [vmem:[%s1879_s1 + $0x84] sm:$0xff]  }
  0x17   : > { %v1504_v47 = vld [vmem:[%s1879_s1 + $0x98] sm:$0xff]   ;;  %v1506_v49 = vld [vmem:[%s1879_s1 + $0xa0] sm:$0xff]   ;;  %v1507_v50 = vld [vmem:[%s1879_s1 + $0x8c] ss:$0 sps:$4 sm:$0xff]  }
  0x18   : > { %v1508_v51 = vld [vmem:[%s1879_s1 + $0xa8] sm:$0xff]   ;;  %v1509_v52 = vld [vmem:[%s1879_s1 + $0xb0] ss:$0 sps:$4 sm:$0xff]  }
  0x19   : > { %586 = vrot.lane.b32.xlu0 %v345_v8, %s1539_s28  ;;  %854 = vrot.lane.b32.xlu1 %v345_v8, %s1540_s29 }
  0x1d   : > { %966 = vperm.xlu0 %1483, %v955_v9   ;;  %971 = vperm.xlu1 %1484, %v956_v10  }
  0x21   : > { %976 = vperm.xlu1 %1484, %v957_v12   ;;  %981 = vperm.xlu0 %1483, %v958_v13  }
  0x25   : > { %986 = vperm.xlu1 %1484, %v959_v14   ;;  %991 = vperm.xlu0 %1483, %v960_v15  }
  0x29   : > { %996 = vperm.xlu1 %1484, %v961_v16   ;;  %1001 = vperm.xlu0 %1483, %v962_v17  }
  0x2d   : > { %1006 = vperm.xlu1 %1484, %v963_v18  }
  0x87   : > { %v347_v19 = vpop.permute.xlu0 %346  ;;  %v721_v28 = vpop.permute.xlu1 %720 }
  0x88   : > { %v366_v20 = vsel %vm364_vm1, %v347_v19, 0  ;;  %v738_v31 = vsel %vm364_vm1, %v721_v28, 0 }
  0x89   : > { %1339 = vmatpush3.bf16.msra.mxu0 %v366_v20  ;;  %1449 = vmatpush3.bf16.msra.mxu1 %v366_v20 }
  0x8a   : > { %1382 = vmatprep.subr.bf16.mxu0 %v1535_v3  ;;  %1360 = vmatprep.subr.bf16.mxu1 %v1535_v3 }
  0x8b   : > { %v587_v23 = vpop.permute.xlu0 %586  ;;  %v855_v32 = vpop.permute.xlu1 %854 }
  0x8c   : > { %v604_v25 = vsel %vm364_vm1, %v587_v23, 0  ;;  %1341 = vmatmul.mubr.msk.bf16.vlgmr.msra.gmra.mxu0 %vm348_vm2, %v1485_v21  ;;  %1353 = vmatmul.mubr.msk.bf16.vlgmr.msra.gmra.mxu1 %vm348_vm2, %v1486_v22  ;;  %v872_v35 = vsel %vm364_vm1, %v855_v32, 0 }
  0x8d   : > { %1383 = vmatpush3.bf16.msra.mxu0 %v604_v25  ;;  %1344 = vmatprep.mubr.msk.bf16.mxu0 %vm1536_vm0, %v1535_v3 }
  0x8e   : > { %1356 = vmatprep.mubr.msk.bf16.mxu1 %vm1536_vm0, %v1535_v3  ;;  %1361 = vmatpush3.bf16.msra.mxu1 %v479_v24 }
  0x8f   : > { %1404 = vmatprep.subr.bf16.mxu1 %v1535_v3  ;;  %1426 = vmatprep.subr.bf16.mxu0 %v1535_v3 }
  0x94   : > { %1345 = vmatmul.mubr.msk.bf16.gmra.mxu0 %vm348_vm2, %v1487_v26  ;;  %1357 = vmatmul.mubr.msk.bf16.gmra.mxu1 %vm348_vm2, %v1488_v27 }
  0x95   : > { %1348 = vmatprep.mubr.msk.bf16.mxu0 %vm1536_vm0, %v1535_v3  ;;  %1362 = vmatprep.mubr.msk.bf16.mxu1 %vm1536_vm0, %v1535_v3 }
  0x9c   : > { %1349 = vmatmul.mubr.msk.bf16.gmra.mxu0 %vm348_vm2, %v1489_v29  ;;  %1363 = vmatmul.mubr.msk.bf16.vlgmr.msra.gmra.mxu1 %vm348_vm2, %v1490_v30 }
  0x9d   : > { %1405 = vmatpush3.bf16.msra.mxu1 %v738_v31  ;;  %1366 = vmatprep.mubr.msk.bf16.mxu1 %vm1536_vm0, %v1535_v3 }
  0x9e   : > { %1384 = vmatprep.mubr.msk.bf16.mxu0 %vm1536_vm0, %v1535_v3 }
  0xa4   : > { %1367 = vmatmul.mubr.msk.bf16.gmra.mxu1 %vm348_vm2, %v1491_v33  ;;  %1385 = vmatmul.mubr.msk.bf16.vlgmr.msra.gmra.mxu0 %vm348_vm2, %v1492_v34 }
  0xa5   : > { %1427 = vmatpush3.bf16.msra.mxu0 %v872_v35  ;;  %1370 = vmatprep.mubr.msk.bf16.mxu1 %vm1536_vm0, %v1535_v3 }
  0xa6   : > { %1388 = vmatprep.mubr.msk.bf16.mxu0 %vm1536_vm0, %v1535_v3 }
  0xac   : > { %1371 = vmatmul.mubr.msk.bf16.gmra.mxu1 %vm348_vm2, %v1493_v36  ;;  %1389 = vmatmul.mubr.msk.bf16.gmra.mxu0 %vm348_vm2, %v1494_v37 }
  0xad   : > { %1374 = vmatprep.mubr.msk.bf16.mxu1 %vm1536_vm0, %v1535_v3  ;;  %1392 = vmatprep.mubr.msk.bf16.mxu0 %vm1536_vm0, %v1535_v3 }
  0xb4   : > { %1375 = vmatmul.mubr.msk.bf16.gmra.mxu1 %vm348_vm2, %v1495_v38  ;;  %1393 = vmatmul.mubr.msk.bf16.gmra.mxu0 %vm348_vm2, %v1496_v39 }
  0xb5   : > { %1378 = vmatprep.mubr.msk.bf16.mxu1 %vm1536_vm0, %v1535_v3  ;;  %1396 = vmatprep.mubr.msk.bf16.mxu0 %vm1536_vm0, %v1535_v3 }
  0xbc   : > { %1379 = vmatmul.mubr.msk.bf16.gmra.mxu1 %vm348_vm2, %v1497_v40  ;;  %1397 = vmatmul.mubr.msk.bf16.gmra.mxu0 %vm348_vm2, %v1498_v41 }
  0xbd   : > { %1400 = vmatprep.mubr.msk.bf16.mxu0 %vm1536_vm0, %v1535_v3  ;;  %1406 = vmatprep.mubr.msk.bf16.mxu1 %vm1536_vm0, %v1535_v3 }
  0xc4   : > { %1401 = vmatmul.mubr.msk.bf16.gmra.mxu0 %vm348_vm2, %v1499_v42  ;;  %1407 = vmatmul.mubr.msk.bf16.vlgmr.msra.gmra.mxu1 %vm348_vm2, %v1500_v43 }
  0xc5   : > { %1410 = vmatprep.mubr.msk.bf16.mxu1 %vm1536_vm0, %v1535_v3  ;;  %1428 = vmatprep.mubr.msk.bf16.mxu0 %vm1536_vm0, %v1535_v3 }
  0xcc   : > { %1411 = vmatmul.mubr.msk.bf16.gmra.mxu1 %vm348_vm2, %v1501_v44  ;;  %1429 = vmatmul.mubr.msk.bf16.vlgmr.msra.gmra.mxu0 %vm348_vm2, %v1502_v45 }
  0xcd   : > { %1414 = vmatprep.mubr.msk.bf16.mxu1 %vm1536_vm0, %v1535_v3  ;;  %1432 = vmatprep.mubr.msk.bf16.mxu0 %vm1536_vm0, %v1535_v3 }
  0xd4   : > { %1415 = vmatmul.mubr.msk.bf16.gmra.mxu1 %vm348_vm2, %v1503_v46  ;;  %1433 = vmatmul.mubr.msk.bf16.gmra.mxu0 %vm348_vm2, %v1504_v47 }
  0xd5   : > { %1418 = vmatprep.mubr.msk.bf16.mxu1 %vm1536_vm0, %v1535_v3  ;;  %1436 = vmatprep.mubr.msk.bf16.mxu0 %vm1536_vm0, %v1535_v3 }
  0xdc   : > { %1419 = vmatmul.mubr.msk.bf16.gmra.mxu1 %vm348_vm2, %v1505_v48  ;;  %1437 = vmatmul.mubr.msk.bf16.gmra.mxu0 %vm348_vm2, %v1506_v49 }
  0xdd   : > { %1422 = vmatprep.mubr.msk.bf16.mxu1 %vm1536_vm0, %v1535_v3  ;;  %1440 = vmatprep.mubr.msk.bf16.mxu0 %vm1536_vm0, %v1535_v3 }
  0xe4   : > { %1423 = vmatmul.mubr.msk.bf16.gmra.mxu1 %vm348_vm2, %v1507_v50  ;;  %1441 = vmatmul.mubr.msk.bf16.gmra.mxu0 %vm348_vm2, %v1508_v51 }
  0xe5   : > { %1444 = vmatprep.mubr.msk.bf16.mxu0 %vm1536_vm0, %v1535_v3 }
  0xec   : > { %1445 = vmatmul.mubr.msk.bf16.gmra.mxu0 %vm348_vm2, %v1509_v52 }
 0x14c   : > { %v402_v53 = vpop.f32.mrf.mxu0  ;;  %v1784_v54 = vpop.f32.mrf.mxu1 }
 0x14e   : > { %v1342_v55 = vpop.f32.mrf.mxu0  ;;  %v1354_v56 = vpop.f32.mrf.mxu1 }
 0x150   : > { %v405_v57 = vpop.f32.mrf.mxu0  ;;  %v1786_v58 = vpop.f32.mrf.mxu1 }
 0x152   : > { %v1343_v59 = vpop.f32.mrf.mxu0  ;;  %v1355_v60 = vpop.f32.mrf.mxu1 }
 0x154   : > { %v1788_v61 = vpop.f32.mrf.mxu0  ;;  %v1790_v62 = vpop.f32.mrf.mxu1 }
 0x156   : > { %v1346_v63 = vpop.f32.mrf.mxu0  ;;  %v1358_v0 = vpop.f32.mrf.mxu1 }
 0x157   : > { %v967_v63 = vpop.permute.xlu0 %966 }
 0x158   : > { %v1792_v1 = vpop.f32.mrf.mxu0  ;;  %v437_v2 = vpop.f32.mrf.mxu1 }
 0x15a   : > { %v1347_v3 = vpop.f32.mrf.mxu0  ;;  %v1359_v4 = vpop.f32.mrf.mxu1 }
 0x15c   : > { %v1794_v5 = vpop.f32.mrf.mxu0  ;;  %v515_v6 = vpop.f32.mrf.mxu1 }
 0x15d   : > { %v516_v49 = vadd.f32 %v515_v6, %v402_v53 }
 0x15e   : > { %v1350_v7 = vpop.f32.mrf.mxu0  ;;  %v1364_v8 = vpop.f32.mrf.mxu1 }
 0x160   : > { %v1796_v9 = vpop.f32.mrf.mxu0  ;;  %v518_v10 = vpop.f32.mrf.mxu1 }
 0x161   : > { %v519_v59 = vadd.f32 %v518_v10, %v405_v57 }
 0x162   : > { %v1351_v11 = vpop.f32.mrf.mxu0  ;;  %v1365_v12 = vpop.f32.mrf.mxu1 }
 0x163   : > { %v972_v12 = vpop.permute.xlu1 %971 }
 0x164   : > { %v523_v13 = vpop.f32.mrf.mxu1  ;;  %v640_v14 = vpop.f32.mrf.mxu0 }
 0x165   : > { %v678_v52 = vadd.f32 %v640_v14, %v516_v49  ;;  %v524_v11 = vadd.f32 %v523_v13, %v1788_v61 }
 0x166   : > { %v1368_v15 = vpop.f32.mrf.mxu1  ;;  %v1386_v16 = vpop.f32.mrf.mxu0 }
 0x168   : > { %v526_v17 = vpop.f32.mrf.mxu1  ;;  %v643_v18 = vpop.f32.mrf.mxu0 }
 0x169   : > { %v679_v3 = vadd.f32 %v643_v18, %v519_v59  ;;  %v527_v61 = vadd.f32 %v526_v17, %v1792_v1  ;;  %v982_v17 = vpop.permute.xlu0 %981 }
 0x16a   : > { %v1369_v19 = vpop.f32.mrf.mxu1  ;;  %v1387_v20 = vpop.f32.mrf.mxu0 }
 0x16c   : > { %v1798_v21 = vpop.f32.mrf.mxu1  ;;  %v648_v22 = vpop.f32.mrf.mxu0 }
 0x16d   : > { %v680_v14 = vadd.f32 %v648_v22, %v524_v11 }
 0x16e   : > { %v1372_v23 = vpop.f32.mrf.mxu1  ;;  %v1390_v24 = vpop.f32.mrf.mxu0 }
 0x170   : > { %v1800_v25 = vpop.f32.mrf.mxu1  ;;  %v651_v26 = vpop.f32.mrf.mxu0 }
 0x172   : > { %v1373_v27 = vpop.f32.mrf.mxu1  ;;  %v1391_v28 = vpop.f32.mrf.mxu0 }
 0x173   : > { %v681_v27 = vadd.f32 %v651_v26, %v527_v61 }
 0x174   : > { %v1802_v29 = vpop.f32.mrf.mxu1  ;;  %v1804_v30 = vpop.f32.mrf.mxu0 }
 0x176   : > { %v1376_v31 = vpop.f32.mrf.mxu1  ;;  %v1394_v32 = vpop.f32.mrf.mxu0 }
 0x177   : > { %v977_v31 = vpop.permute.xlu1 %976 }
 0x178   : > { %v1806_v33 = vpop.f32.mrf.mxu1  ;;  %v1808_v34 = vpop.f32.mrf.mxu0 }
 0x179   : > { %v543_v11 = vadd.f32 %v1806_v33, %v1786_v58 }
 0x17a   : > { %v1377_v35 = vpop.f32.mrf.mxu1  ;;  %v1395_v36 = vpop.f32.mrf.mxu0 }
 0x17b   : > { %v532_v36 = vadd.f32 %v1798_v21, %v1794_v5 }
 0x17c   : > { %v1810_v37 = vpop.f32.mrf.mxu1  ;;  %v1812_v38 = vpop.f32.mrf.mxu0 }
 0x17e   : > { %v1380_v39 = vpop.f32.mrf.mxu1  ;;  %v1398_v40 = vpop.f32.mrf.mxu0 }
 0x180   : > { %v550_v41 = vpop.f32.mrf.mxu1  ;;  %v1814_v42 = vpop.f32.mrf.mxu0 }
 0x182   : > { %v1381_v43 = vpop.f32.mrf.mxu1  ;;  %v1399_v44 = vpop.f32.mrf.mxu0 }
 0x183   : > { %v682_v43 = vadd.f32 %v1804_v30, %v532_v36 }
 0x184   : > { %v1816_v45 = vpop.f32.mrf.mxu0  ;;  %v774_v46 = vpop.f32.mrf.mxu1 }
 0x185   : > { %v812_v60 = vadd.f32 %v774_v46, %v678_v52 }
 0x186   : > { %v1402_v47 = vpop.f32.mrf.mxu0  ;;  %v1408_v48 = vpop.f32.mrf.mxu1 }
 0x187   : > { %v535_v48 = vadd.f32 %v1800_v25, %v1796_v9  ;;  %v540_v25 = vadd.f32 %v1802_v29, %v1784_v54 }
 0x188   : > { %v675_v50 = vpop.f32.mrf.mxu0  ;;  %v777_v51 = vpop.f32.mrf.mxu1 }
 0x189   : > { %v813_v53 = vadd.f32 %v777_v51, %v679_v3  ;;  %v683_v30 = vadd.f32 %v1808_v34, %v535_v48  ;;  %v987_v51 = vpop.permute.xlu1 %986 }
 0x18a   : > { %v1403_v55 = vpop.f32.mrf.mxu0  ;;  %v1409_v56 = vpop.f32.mrf.mxu1 }
 0x18c   : > { %v782_v0 = vpop.f32.mrf.mxu1  ;;  %v908_v2 = vpop.f32.mrf.mxu0 }
 0x18d   : > { %v946_v4 = vadd.f32 %v908_v2, %v812_v60  ;;  %v814_v13 = vadd.f32 %v782_v0, %v680_v14  ;;  %v684_v2 = vadd.f32 %v1812_v38, %v540_v25 }
 0x18e   : > { %v1412_v7 = vpop.f32.mrf.mxu1  ;;  %v1430_v8 = vpop.f32.mrf.mxu0 }
 0x18f   : > { %v1009_v6 = vadd.f32 %v967_v63, %v946_v4  ;;  %v992_v4 = vpop.permute.xlu0 %991 }
 0x190   : > { %v785_v57 = vpop.f32.mrf.mxu1  ;;  %v911_v10 = vpop.f32.mrf.mxu0 }
 0x191   : > { %v1018_v15 = vmax.f32 %v1009_v6, 0.0  ;;  %v947_v16 = vadd.f32 %v911_v10, %v813_v53  ;;  %v815_v39 = vadd.f32 %v785_v57, %v681_v27  ;;  %v997_v57 = vpop.permute.xlu1 %996 }
 0x192   : > { %v1413_v18 = vpop.f32.mrf.mxu1  ;;  %v1431_v19 = vpop.f32.mrf.mxu0 }
 0x193   : > { %1028 = vst.msk [vmem:[%s1826_s13] sm:$0xff] %vm1027_vm3, %v1018_v15  ;;  %v1010_v20 = vadd.f32 %v972_v12, %v947_v16  ;;  %v685_v12 = vadd.f32 %v1814_v42, %v543_v11  ;;  %v548_v16 = vadd.f32 %v1810_v37, %v1790_v62  ;;  %v1002_v61 = vpop.permute.xlu0 %1001 }
 0x194   : > { %v790_v23 = vpop.f32.mrf.mxu1  ;;  %v916_v24 = vpop.f32.mrf.mxu0 }
 0x195   : > { %v1019_v28 = vmax.f32 %v1010_v20, 0.0  ;;  %v948_v32 = vadd.f32 %v916_v24, %v814_v13  ;;  %v816_v49 = vadd.f32 %v790_v23, %v682_v43  ;;  %v686_v42 = vadd.f32 %v1816_v45, %v548_v16 }
 0x196   : > { %v1416_v35 = vpop.f32.mrf.mxu1  ;;  %v1434_v22 = vpop.f32.mrf.mxu0 }
 0x197   : > { %1029 = vst.msk [vmem:[%s1826_s13 + $0x8] sm:$0xff] %vm1027_vm3, %v1019_v28  ;;  %v1011_v1 = vadd.f32 %v977_v31, %v948_v32  ;;  %v1007_v32 = vpop.permute.xlu1 %1006 }
 0x198   : > { %v793_v40 = vpop.f32.mrf.mxu1  ;;  %v919_v41 = vpop.f32.mrf.mxu0 }
 0x199   : > { %v1020_v26 = vmax.f32 %v1011_v1, 0.0  ;;  %v949_v44 = vadd.f32 %v919_v41, %v815_v39  ;;  %v817_v59 = vadd.f32 %v793_v40, %v683_v30 }
 0x19a   : > { %v1417_v46 = vpop.f32.mrf.mxu1  ;;  %v1435_v47 = vpop.f32.mrf.mxu0 }
 0x19b   : > { %1030 = vst.msk [vmem:[%s1826_s13 + $0x10] sm:$0xff] %vm1027_vm3, %v1020_v26  ;;  %v1012_v5 = vadd.f32 %v982_v17, %v949_v44 }
 0x19c   : > { %v798_v21 = vpop.f32.mrf.mxu1  ;;  %v924_v50 = vpop.f32.mrf.mxu0 }
 0x19d   : > { %v1021_v52 = vmax.f32 %v1012_v5, 0.0  ;;  %v950_v55 = vadd.f32 %v924_v50, %v816_v49  ;;  %v818_v53 = vadd.f32 %v798_v21, %v684_v2 }
 0x19e   : > { %v1420_v56 = vpop.f32.mrf.mxu1  ;;  %v1438_v9 = vpop.f32.mrf.mxu0 }
 0x19f   : > { %1031 = vst.msk [vmem:[%s1844_s15] sm:$0xff] %vm1027_vm3, %v1021_v52  ;;  %v1013_v60 = vadd.f32 %v987_v51, %v950_v55 }
 0x1a0   : > { %v801_v63 = vpop.f32.mrf.mxu1  ;;  %v927_v0 = vpop.f32.mrf.mxu0 }
 0x1a1   : > { %v1022_v3 = vmax.f32 %v1013_v60, 0.0  ;;  %v951_v34 = vadd.f32 %v927_v0, %v817_v59  ;;  %v819_v18 = vadd.f32 %v801_v63, %v685_v12 }
 0x1a2   : > { %v1421_v7 = vpop.f32.mrf.mxu1  ;;  %v1439_v8 = vpop.f32.mrf.mxu0 }
 0x1a3   : > { %1032 = vst.msk [vmem:[%s1844_s15 + $0x8] sm:$0xff] %vm1027_vm3, %v1022_v3  ;;  %v1014_v54 = vadd.f32 %v992_v4, %v951_v34 }
 0x1a4   : > { %v806_v29 = vpop.f32.mrf.mxu1  ;;  %v932_v6 = vpop.f32.mrf.mxu0 }
 0x1a5   : > { %v1023_v38 = vmax.f32 %v1014_v54, 0.0  ;;  %v952_v10 = vadd.f32 %v932_v6, %v818_v53  ;;  %v820_v27 = vadd.f32 %v806_v29, %v686_v42 }
 0x1a6   : > { %v1442_v14 = vpop.f32.mrf.mxu0  ;;  %v1424_v15 = vpop.f32.mrf.mxu1 }
 0x1a7   : > { %1033 = vst.msk [vmem:[%s1844_s15 + $0x10] sm:$0xff] %vm1027_vm3, %v1023_v38  ;;  %v1015_v58 = vadd.f32 %v997_v57, %v952_v10 }
 0x1a8   : > { %v935_v33 = vpop.f32.mrf.mxu0  ;;  %v809_v19 = vpop.f32.mrf.mxu1 }
 0x1a9   : > { %v1024_v13 = vmax.f32 %v1015_v58, 0.0  ;;  %v953_v20 = vadd.f32 %v935_v33, %v819_v18 }
 0x1aa   : > { %v1443_v23 = vpop.f32.mrf.mxu0  ;;  %v1425_v24 = vpop.f32.mrf.mxu1 }
 0x1ab   : > { %1034 = vst.msk [vmem:[%s293_s22] sm:$0xff] %vm1027_vm3, %v1024_v13  ;;  %v1016_v62 = vadd.f32 %v1002_v61, %v953_v20 }
 0x1ac   : > { %v940_v37 = vpop.f32.mrf.mxu0 }
 0x1ad   : > { %v1025_v28 = vmax.f32 %v1016_v62, 0.0  ;;  %v954_v31 = vadd.f32 %v940_v37, %v820_v27 }
 0x1ae   : > { %v1446_v35 = vpop.f32.mrf.mxu0 }
 0x1af   : > { %1035 = vst.msk [vmem:[%s293_s22 + $0x8] sm:$0xff] %vm1027_vm3, %v1025_v28  ;;  %v1017_v22 = vadd.f32 %v1007_v32, %v954_v31 }
 0x1b0   : > { %v943_v36 = vpop.f32.mrf.mxu0 }
 0x1b1   : > { %v1026_v39 = vmax.f32 %v1017_v22, 0.0 }
 0x1b2   : > { %v1447_v45 = vpop.f32.mrf.mxu0 }
 0x1b3   : > { %1036 = vst.msk [vmem:[%s293_s22 + $0x10] sm:$0xff] %vm1027_vm3, %v1026_v39 }
 0x1b4 PF: > { %s16_s20 = sadd.s32 1, %s1532_s20   ;;  %s1884_s18 = smov %s1528_s19 }
 0x1b5   : > { %p13_p5 = scmp.ge.s32.totalorder %s16_s20, 4   ;;  %s1885_s19 = smov %s1887_s21 }
 0x1b7   :  { %15 = sbr.rel (!%p13_p5) target bundleno = 2 (0x2), region = 90 }

</bundles_post_ra>
